<compile_context>
chip_gen: v7x
topology: tpu7x:2x2x1
jax: 0.10.0
libtpu: 0.0.40
codegen_flags: <defaults>
</compile_context>

<pallas_src>
import math
import functools

import jax
import jax.numpy as jnp
from jax.experimental import pallas as pl
from jax.experimental.pallas import tpu as pltpu


NEG_INF = -1e9  # finite "minus infinity" for additive attention masks


def _pick_tile(dim, targets):
    """Largest target tile that evenly divides dim; otherwise the full dim
    (full-dim blocks always satisfy the (8,128) BlockSpec constraint)."""
    for t in targets:
        if dim >= t and dim % t == 0:
            return t
    return dim


def _compiler_params(semantics, block_bytes):
    """Explicit scoped-VMEM budget: >= 32 MiB (raises v5e default), <= 64 MiB
    (v7x physical), with headroom over the actual double-buffered tile bytes."""
    limit = int(min(max(2 * block_bytes + (4 << 20), 32 << 20), 64 << 20))
    return pltpu.CompilerParams(dimension_semantics=semantics,
                                vmem_limit_bytes=limit)


# --------------------------------------------------------------------------
# Tiled matmul + bias kernel: bf16 MXU inputs, fp32 accumulation
# --------------------------------------------------------------------------

def _matmul_bias_kernel(x_ref, w_ref, b_ref, o_ref, acc_ref):
    @pl.when(pl.program_id(2) == 0)
    def _():
        acc_ref[...] = jnp.zeros_like(acc_ref)

    acc_ref[...] += jnp.dot(x_ref[...], w_ref[...],
                            preferred_element_type=jnp.float32)

    @pl.when(pl.program_id(2) == pl.num_programs(2) - 1)
    def _():
        o_ref[...] = (acc_ref[...] + b_ref[...]).astype(o_ref.dtype)


def matmul_bias(x, w, b, out_dtype=jnp.bfloat16):
    """x: (N, Din) bf16 @ w: (Din, Dout) bf16 + b: (Dout,) f32 -> (N, Dout)."""
    n, d_in = x.shape
    d_out = w.shape[1]
    tm = _pick_tile(n, (512, 256))
    tn = _pick_tile(d_out, (512, 256))
    tk = _pick_tile(d_in, (1024, 512, 256))
    grid = (n // tm, d_out // tn, d_in // tk)
    out_size = jnp.dtype(out_dtype).itemsize
    blk_bytes = 2 * (tm * tk + tk * tn) + 4 * tn + out_size * tm * tn + 4 * tm * tn
    return pl.pallas_call(
        _matmul_bias_kernel,
        out_shape=jax.ShapeDtypeStruct((n, d_out), out_dtype),
        grid=grid,
        in_specs=[
            pl.BlockSpec((tm, tk), lambda i, j, k: (i, k)),
            pl.BlockSpec((tk, tn), lambda i, j, k: (k, j)),
            pl.BlockSpec((1, tn), lambda i, j, k: (0, j)),
        ],
        out_specs=pl.BlockSpec((tm, tn), lambda i, j, k: (i, j)),
        scratch_shapes=[pltpu.VMEM((tm, tn), jnp.float32)],
        compiler_params=_compiler_params(
            ("parallel", "parallel", "arbitrary"), blk_bytes),
    )(x, w, b.reshape(1, d_out))


# --------------------------------------------------------------------------
# Fused residual-add + LayerNorm kernel (fp32 math, bf16 I/O)
# --------------------------------------------------------------------------

def _add_layernorm_kernel(x_ref, y_ref, g_ref, b_ref, o_ref, *, eps):
    x = x_ref[...].astype(jnp.float32) + y_ref[...].astype(jnp.float32)
    mean = jnp.mean(x, axis=-1, keepdims=True)
    xc = x - mean
    var = jnp.mean(xc * xc, axis=-1, keepdims=True)
    y = xc * jax.lax.rsqrt(var + eps)
    o_ref[...] = (y * g_ref[...] + b_ref[...]).astype(o_ref.dtype)


def add_layer_norm(x2d, y2d, gamma, beta, eps=1e-5):
    """LayerNorm(x + y) over last dim of (N, D) bf16 arrays (PyTorch eps=1e-5)."""
    n, d = x2d.shape
    tm = _pick_tile(n, (512, 256))        # v5e-safe tile targets
    blk_bytes = 2 * 2 * tm * d + 2 * 4 * d + 2 * tm * d + 4 * tm * d
    return pl.pallas_call(
        functools.partial(_add_layernorm_kernel, eps=eps),
        out_shape=jax.ShapeDtypeStruct((n, d), jnp.bfloat16),
        grid=(n // tm,),
        in_specs=[
            pl.BlockSpec((tm, d), lambda i: (i, 0)),
            pl.BlockSpec((tm, d), lambda i: (i, 0)),
            pl.BlockSpec((1, d), lambda i: (0, 0)),
            pl.BlockSpec((1, d), lambda i: (0, 0)),
        ],
        out_specs=pl.BlockSpec((tm, d), lambda i: (i, 0)),
        compiler_params=_compiler_params(("parallel",), blk_bytes),
    )(x2d, y2d, gamma.reshape(1, d), beta.reshape(1, d))


# --------------------------------------------------------------------------
# Fused FFN kernel: linear1 + relu + linear2 with the hidden (ffd) dim
# streamed in chunks; partial linear2 results accumulate in fp32 VMEM.
# --------------------------------------------------------------------------

def _ffn_kernel(x_ref, w1_ref, b1_ref, w2_ref, b2_ref, o_ref, acc_ref):
    @pl.when(pl.program_id(1) == 0)
    def _():
        acc_ref[...] = jnp.zeros_like(acc_ref)

    h = jnp.dot(x_ref[...], w1_ref[...], preferred_element_type=jnp.float32)
    h = jnp.maximum(h + b1_ref[...], 0.0)
    acc_ref[...] += jnp.dot(h.astype(w2_ref.dtype), w2_ref[...],
                            preferred_element_type=jnp.float32)

    @pl.when(pl.program_id(1) == pl.num_programs(1) - 1)
    def _():
        o_ref[...] = (acc_ref[...] + b2_ref[...]).astype(o_ref.dtype)


def ffn(x2d, p):
    n, e = x2d.shape
    ffd = p["linear1"]["w"].shape[1]
    tm = _pick_tile(n, (256, 128))
    tf = _pick_tile(ffd, (512, 256))
    blk_bytes = (2 * tm * e + 2 * e * tf + 4 * tf + 2 * tf * e + 4 * e
                 + 2 * tm * e + 4 * tm * e + 4 * tm * tf)
    return pl.pallas_call(
        _ffn_kernel,
        out_shape=jax.ShapeDtypeStruct((n, e), jnp.bfloat16),
        grid=(n // tm, ffd // tf),
        in_specs=[
            pl.BlockSpec((tm, e), lambda i, f: (i, 0)),
            pl.BlockSpec((e, tf), lambda i, f: (0, f)),
            pl.BlockSpec((1, tf), lambda i, f: (0, f)),
            pl.BlockSpec((tf, e), lambda i, f: (f, 0)),
            pl.BlockSpec((1, e), lambda i, f: (0, 0)),
        ],
        out_specs=pl.BlockSpec((tm, e), lambda i, f: (i, 0)),
        scratch_shapes=[pltpu.VMEM((tm, e), jnp.float32)],
        compiler_params=_compiler_params(("parallel", "arbitrary"), blk_bytes),
    )(x2d, p["linear1"]["w"], p["linear1"]["b"].reshape(1, ffd),
      p["linear2"]["w"], p["linear2"]["b"].reshape(1, e))


# --------------------------------------------------------------------------
# Flash-style attention: grid (B, H, Lq-tiles, Lk-tiles), online softmax.
# attn_mask (Lq, Lk) and key-padding bias (B, 1, Lk) combined in-kernel —
# no (B, Lq, Lk) mask is ever materialized in HBM.
# --------------------------------------------------------------------------

def _flash_attention_kernel(q_ref, k_ref, v_ref, mask_ref, kpm_ref, o_ref,
                            m_scr, l_scr, acc_scr):
    ki = pl.program_id(3)

    @pl.when(ki == 0)
    def _():
        m_scr[...] = jnp.full_like(m_scr, -1e30)
        l_scr[...] = jnp.zeros_like(l_scr)
        acc_scr[...] = jnp.zeros_like(acc_scr)

    # q: (tq, hd) bf16 (scale already folded into q-projection weights)
    # k,v: (tk, hd) bf16; mask: (tq, tk) fp32; kpm: (1, tk) fp32 additive.
    s = jax.lax.dot_general(q_ref[...], k_ref[...],
                            (((1,), (1,)), ((), ())),
                            preferred_element_type=jnp.float32)
    s = s + mask_ref[...] + kpm_ref[...]

    m_prev = m_scr[...]
    m_new = jnp.maximum(m_prev, jnp.max(s, axis=-1, keepdims=True))
    alpha = jnp.exp(m_prev - m_new)
    p = jnp.exp(s - m_new)
    l_scr[...] = alpha * l_scr[...] + jnp.sum(p, axis=-1, keepdims=True)
    acc_scr[...] = alpha * acc_scr[...] + jnp.dot(
        p.astype(v_ref.dtype), v_ref[...], preferred_element_type=jnp.float32)
    m_scr[...] = m_new

    @pl.when(ki == pl.num_programs(3) - 1)
    def _():
        o_ref[...] = (acc_scr[...] *
                      pl.reciprocal(l_scr[...], approx=True)).astype(o_ref.dtype)


def flash_attention(q, k, v, attn_mask, kpm_bias):
    """q,k,v: (B, H, L, hd) bf16; attn_mask: (Lq, Lk) fp32; kpm: (B, 1, Lk) fp32."""
    b, h, lq, hd = q.shape
    lk = k.shape[2]
    tq = _pick_tile(lq, (256, 128))
    tk = _pick_tile(lk, (512, 256, 128))
    blk_bytes = (2 * tq * hd + 2 * 2 * tk * hd + 4 * tq * tk + 4 * tk
                 + 2 * tq * hd + 4 * tq * (hd + 2))
    return pl.pallas_call(
        _flash_attention_kernel,
        out_shape=jax.ShapeDtypeStruct((b, h, lq, hd), jnp.bfloat16),
        grid=(b, h, lq // tq, lk // tk),
        in_specs=[
            pl.BlockSpec((None, None, tq, hd), lambda bi, hi, qi, ki: (bi, hi, qi, 0)),
            pl.BlockSpec((None, None, tk, hd), lambda bi, hi, qi, ki: (bi, hi, ki, 0)),
            pl.BlockSpec((None, None, tk, hd), lambda bi, hi, qi, ki: (bi, hi, ki, 0)),
            pl.BlockSpec((tq, tk), lambda bi, hi, qi, ki: (qi, ki)),
            pl.BlockSpec((None, 1, tk), lambda bi, hi, qi, ki: (bi, 0, ki)),
        ],
        out_specs=pl.BlockSpec((None, None, tq, hd),
                               lambda bi, hi, qi, ki: (bi, hi, qi, 0)),
        scratch_shapes=[pltpu.VMEM((tq, 1), jnp.float32),
                        pltpu.VMEM((tq, 1), jnp.float32),
                        pltpu.VMEM((tq, hd), jnp.float32)],
        compiler_params=_compiler_params(
            ("parallel", "parallel", "parallel", "arbitrary"), blk_bytes),
    )(q, k, v, attn_mask, kpm_bias)


# --------------------------------------------------------------------------
# Model building blocks (plain-JAX glue around the kernels)
# --------------------------------------------------------------------------

def positional_encoding_table(emb_size, maxlen=5000):
    den = jnp.exp(-jnp.arange(0, emb_size, 2, dtype=jnp.float32)
                  * math.log(10000.0) / emb_size)
    pos = jnp.arange(0, maxlen, dtype=jnp.float32).reshape(maxlen, 1)
    pe = jnp.zeros((maxlen, emb_size), dtype=jnp.float32)
    pe = pe.at[:, 0::2].set(jnp.sin(pos * den))
    pe = pe.at[:, 1::2].set(jnp.cos(pos * den))
    return pe[:, None, :]  # (maxlen, 1, emb)


def multi_head_attention(x_q, x_kv, p, attn_mask, key_padding_mask, num_heads,
                         self_attention):
    """x_q: (Lq, B, E), x_kv: (Lk, B, E) bf16 → (Lq*B, E) bf16 (PyTorch MHA)."""
    lq, b, e = x_q.shape
    lk = x_kv.shape[0]
    hd = e // num_heads

    if self_attention:
        # One fused (E, 3E) projection for Q, K, V (q-scale baked into weights).
        qkv = matmul_bias(x_q.reshape(lq * b, e), p["w_qkv"], p["b_qkv"])
        qkv = qkv.reshape(lq, b, 3, num_heads, hd).transpose(2, 1, 3, 0, 4)
        q, k, v = qkv[0], qkv[1], qkv[2]                      # (B, H, L, hd)
    else:
        q = matmul_bias(x_q.reshape(lq * b, e), p["wq"], p["bq"])
        q = q.reshape(lq, b, num_heads, hd).transpose(1, 2, 0, 3)
        kv = matmul_bias(x_kv.reshape(lk * b, e), p["w_kv"], p["b_kv"])
        kv = kv.reshape(lk, b, 2, num_heads, hd).transpose(2, 1, 3, 0, 4)
        k, v = kv[0], kv[1]

    if attn_mask is None:
        attn_mask = jnp.zeros((lq, lk), jnp.float32)
    else:
        attn_mask = attn_mask.astype(jnp.float32)
    if key_padding_mask is None:
        kpm_bias = jnp.zeros((b, 1, lk), jnp.float32)
    else:
        kpm_bias = jnp.where(key_padding_mask, jnp.float32(NEG_INF),
                             jnp.float32(0.0)).reshape(b, 1, lk)

    out = flash_attention(q, k, v, attn_mask, kpm_bias)       # (B, H, Lq, hd) bf16
    out = out.transpose(2, 0, 1, 3).reshape(lq * b, e)
    return matmul_bias(out, p["wo"], p["bo"])                 # (Lq*B, E) bf16


def encoder_layer_forward(x, p, src_mask, src_kpm, num_heads):
    l, b, e = x.shape
    x2 = x.reshape(l * b, e)
    sa = multi_head_attention(x, x, p["self_attn"], src_mask, src_kpm,
                              num_heads, self_attention=True)
    x2 = add_layer_norm(x2, sa, p["norm1"]["g"], p["norm1"]["b"])
    ff = ffn(x2, p)
    x2 = add_layer_norm(x2, ff, p["norm2"]["g"], p["norm2"]["b"])
    return x2.reshape(l, b, e)


def decoder_layer_forward(x, memory, p, tgt_mask, memory_mask,
                          tgt_kpm, mem_kpm, num_heads):
    l, b, e = x.shape
    x2 = x.reshape(l * b, e)
    sa = multi_head_attention(x, x, p["self_attn"], tgt_mask, tgt_kpm,
                              num_heads, self_attention=True)
    x2 = add_layer_norm(x2, sa, p["norm1"]["g"], p["norm1"]["b"])
    ca = multi_head_attention(x2.reshape(l, b, e), memory, p["cross_attn"],
                              memory_mask, mem_kpm, num_heads,
                              self_attention=False)
    x2 = add_layer_norm(x2, ca, p["norm2"]["g"], p["norm2"]["b"])
    ff = ffn(x2, p)
    x2 = add_layer_norm(x2, ff, p["norm3"]["g"], p["norm3"]["b"])
    return x2.reshape(l, b, e)


def seq2seq_transformer_forward(params, args, src, tgt, src_mask, tgt_mask,
                                src_padding_mask, tgt_padding_mask,
                                memory_key_padding_mask):
    e, h = args["emb_size"], args["head"]

    tgt = tgt[:, :-1]                 # (B, Lt-1)
    src = src.T                       # (Ls, B)
    tgt = tgt.T                       # (Lt-1, B)

    pe = params["pos_embedding"]
    scale = math.sqrt(e)
    # Embedding gather stays in plain JAX (no clean Pallas equivalent at this size).
    src_emb = (jnp.take(params["tok_emb"], src, axis=0) * scale
               + pe[:src.shape[0]]).astype(jnp.bfloat16)
    tgt_emb = (jnp.take(params["tok_emb"], tgt, axis=0) * scale
               + pe[:tgt.shape[0]]).astype(jnp.bfloat16)

    memory = src_emb
    for lp in params["encoder_layers"]:
        memory = encoder_layer_forward(memory, lp, src_mask[0], src_padding_mask, h)

    out = tgt_emb
    for lp in params["decoder_layers"]:
        out = decoder_layer_forward(out, memory, lp, tgt_mask[0], None,
                                    tgt_padding_mask, memory_key_padding_mask, h)

    # Transpose the small (Lt,B,E) activation (not the large logits) so the
    # generator writes (B, Lt-1, V) directly.
    lt, b, _ = out.shape
    v = params["generator"]["w"].shape[1]
    out_bt = out.transpose(1, 0, 2).reshape(b * lt, e)
    logits = matmul_bias(out_bt, params["generator"]["w"],
                         params["generator"]["b"], out_dtype=jnp.float32)
    return logits.reshape(b, lt, v)   # (B, Lt-1, V)


# --------------------------------------------------------------------------
# Deterministic parameter init (weights pre-cast to bf16, biases fp32,
# softmax 1/sqrt(hd) scale baked into the q projection)
# --------------------------------------------------------------------------

def init_params(key, args):
    e, ff, heads = args["emb_size"], args["dim_feedforward"], args["head"]
    hd = e // heads
    q_scale = 1.0 / math.sqrt(hd)
    keys = iter(jax.random.split(key, 512))

    def nk():
        return next(keys)

    def lin(d_in, d_out):
        return {"w": jax.random.normal(nk(), (d_in, d_out), jnp.float32) / math.sqrt(d_in),
                "b": 0.01 * jax.random.normal(nk(), (d_out,), jnp.float32)}

    def lin_bf16(d_in, d_out):
        p = lin(d_in, d_out)
        return {"w": p["w"].astype(jnp.bfloat16), "b": p["b"]}

    def attn():
        ws = {name: lin(e, e) for name in ("q", "k", "v", "o")}
        wq = ws["q"]["w"] * q_scale         # bake softmax scale into q proj
        bq = ws["q"]["b"] * q_scale
        return {
            # fused projections (bf16 weights, fp32 biases)
            "w_qkv": jnp.concatenate([wq, ws["k"]["w"], ws["v"]["w"]],
                                     axis=1).astype(jnp.bfloat16),
            "b_qkv": jnp.concatenate([bq, ws["k"]["b"], ws["v"]["b"]]),
            "w_kv": jnp.concatenate([ws["k"]["w"], ws["v"]["w"]],
                                    axis=1).astype(jnp.bfloat16),
            "b_kv": jnp.concatenate([ws["k"]["b"], ws["v"]["b"]]),
            # split q (for cross-attention) and output proj
            "wq": wq.astype(jnp.bfloat16), "bq": bq,
            "wo": ws["o"]["w"].astype(jnp.bfloat16), "bo": ws["o"]["b"],
        }

    def norm():
        return {"g": jnp.ones((e,), jnp.float32), "b": jnp.zeros((e,), jnp.float32)}

    def enc_layer():
        return {"self_attn": attn(), "linear1": lin_bf16(e, ff),
                "linear2": lin_bf16(ff, e), "norm1": norm(), "norm2": norm()}

    def dec_layer():
        return {"self_attn": attn(), "cross_attn": attn(),
                "linear1": lin_bf16(e, ff), "linear2": lin_bf16(ff, e),
                "norm1": norm(), "norm2": norm(), "norm3": norm()}

    return {
        "tok_emb": jax.random.normal(nk(), (args["src_vocab_size"], e), jnp.float32),
        "pos_embedding": positional_encoding_table(e, maxlen=5000),
        "encoder_layers": [enc_layer() for _ in range(args["encoder_layer_num"])],
        "decoder_layers": [dec_layer() for _ in range(args["decoder_layer_num"])],
        "generator": lin_bf16(e, args["tgt_vocab_size"]),
    }


# --------------------------------------------------------------------------
# Example run
# --------------------------------------------------------------------------

if __name__ == "__main__":
    args = dict(emb_size=32, head=4, dim_feedforward=64,
                src_vocab_size=50, tgt_vocab_size=60, dropout=0.0,
                encoder_layer_num=2, decoder_layer_num=2)

    key = jax.random.PRNGKey(0)
    pkey, skey, tkey = jax.random.split(key, 3)
    params = init_params(pkey, args)

    B, Ls, Lt = 2, 8, 9           # decoder sees Lt - 1 = 8 positions
    Ltd = Lt - 1
    src = jax.random.randint(skey, (B, Ls), 0, args["src_vocab_size"], dtype=jnp.int32)
    tgt = jax.random.randint(tkey, (B, Lt), 0, args["src_vocab_size"], dtype=jnp.int32)

    # masks mirror the PyTorch call signature (leading dim indexed with [0]);
    # large finite negative instead of -inf avoids NaNs on fully-masked rows.
    src_mask = jnp.zeros((1, Ls, Ls), jnp.float32)
    causal = jnp.where(jnp.triu(jnp.ones((Ltd, Ltd), dtype=bool), k=1),
                       jnp.float32(NEG_INF), jnp.float32(0.0))
    tgt_mask = causal[None]
    src_padding_mask = jnp.zeros((B, Ls), dtype=bool).at[1, -1].set(True)
    tgt_padding_mask = jnp.zeros((B, Ltd), dtype=bool)
    memory_key_padding_mask = src_padding_mask

    logits = seq2seq_transformer_forward(
        params, args, src, tgt, src_mask, tgt_mask,
        src_padding_mask, tgt_padding_mask, memory_key_padding_mask)
    jax.block_until_ready(logits)

    assert logits.shape == (B, Ltd, args["tgt_vocab_size"]), logits.shape
    assert bool(jnp.all(jnp.isfinite(logits)))
    print("KERNEL_OK")
</pallas_src>

<mosaic_0001>
module attributes {stable_mosaic.version = 11 : i64} {
  func.func @_matmul_bias_kernel(%arg0: i32, %arg1: i32, %arg2: i32, %arg3: memref<16x32xbf16, #tpu.memory_space<vmem>>, %arg4: memref<32x96xbf16, #tpu.memory_space<vmem>>, %arg5: memref<1x96xf32, #tpu.memory_space<vmem>>, %arg6: memref<16x96xbf16, #tpu.memory_space<vmem>>, %arg7: memref<16x96xf32, #tpu.memory_space<vmem>>) attributes {dimension_semantics = [#tpu.dimension_semantics<parallel>, #tpu.dimension_semantics<parallel>, #tpu.dimension_semantics<arbitrary>], iteration_bounds = array<i64: 1, 1, 1>, scalar_prefetch = 0 : i64, scratch_operands = 1 : i64, tpu.core_type = #tpu.core_type<tc>, window_params = [{transform_indices = @transform_0, window_bounds = array<i64: 16, 32>}, {transform_indices = @transform_1, window_bounds = array<i64: 32, 96>}, {transform_indices = @transform_2, window_bounds = array<i64: 1, 96>}, {transform_indices = @transform_3, window_bounds = array<i64: 16, 96>}]} {
    %c0_i32 = arith.constant 0 : i32
    %0 = arith.cmpi eq, %arg2, %c0_i32 : i32
    %1 = arith.extui %0 : i1 to i32
    %c0_i32_0 = arith.constant 0 : i32
    %2 = arith.cmpi ne, %1, %c0_i32_0 : i32
    scf.if %2 {
      %cst_10 = arith.constant 0.000000e+00 : f32
      %12 = vector.broadcast %cst_10 : f32 to vector<16x96xf32>
      %c0_11 = arith.constant 0 : index
      %c0_12 = arith.constant 0 : index
      %13 = vector.load %arg7[%c0_11, %c0_12] : memref<16x96xf32, #tpu.memory_space<vmem>>, vector<16x96xf32>
      tpu.vector_store %arg7[%c0_11, %c0_12], %12 {strides = array<i32>} : memref<16x96xf32, #tpu.memory_space<vmem>>, vector<16x96xf32>,
    } else {
    }
    %c0 = arith.constant 0 : index
    %c0_1 = arith.constant 0 : index
    %3 = vector.load %arg7[%c0, %c0_1] : memref<16x96xf32, #tpu.memory_space<vmem>>, vector<16x96xf32>
    %c0_2 = arith.constant 0 : index
    %c0_3 = arith.constant 0 : index
    %4 = vector.load %arg3[%c0_2, %c0_3] : memref<16x32xbf16, #tpu.memory_space<vmem>>, vector<16x32xbf16>
    %c0_4 = arith.constant 0 : index
    %c0_5 = arith.constant 0 : index
    %5 = vector.load %arg4[%c0_4, %c0_5] : memref<32x96xbf16, #tpu.memory_space<vmem>>, vector<32x96xbf16>
    %cst = arith.constant dense<0.000000e+00> : vector<16x96xf32>
    %6 = tpu.matmul %4, %5, %cst {dimension_numbers = #tpu.dot_dimension_numbers<[1], [0], [0], [1], [0, 0, 1, 1], [], []>} : vector<16x32xbf16>, vector<32x96xbf16>, vector<16x96xf32> -> vector<16x96xf32>
    %7 = arith.addf %3, %6 : vector<16x96xf32>
    %c0_6 = arith.constant 0 : index
    %c0_7 = arith.constant 0 : index
    %8 = vector.load %arg7[%c0_6, %c0_7] : memref<16x96xf32, #tpu.memory_space<vmem>>, vector<16x96xf32>
    tpu.vector_store %arg7[%c0_6, %c0_7], %7 {strides = array<i32>} : memref<16x96xf32, #tpu.memory_space<vmem>>, vector<16x96xf32>,
    %c0_i32_8 = arith.constant 0 : i32
    %9 = arith.cmpi eq, %arg2, %c0_i32_8 : i32
    %10 = arith.extui %9 : i1 to i32
    %c0_i32_9 = arith.constant 0 : i32
    %11 = arith.cmpi ne, %10, %c0_i32_9 : i32
    scf.if %11 {
      %c0_10 = arith.constant 0 : index
      %c0_11 = arith.constant 0 : index
      %12 = vector.load %arg7[%c0_10, %c0_11] : memref<16x96xf32, #tpu.memory_space<vmem>>, vector<16x96xf32>
      %c0_12 = arith.constant 0 : index
      %c0_13 = arith.constant 0 : index
      %13 = vector.load %arg5[%c0_12, %c0_13] : memref<1x96xf32, #tpu.memory_space<vmem>>, vector<1x96xf32>
      %14 = vector.broadcast %13 : vector<1x96xf32> to vector<16x96xf32>
      %15 = arith.addf %12, %14 : vector<16x96xf32>
      %16 = arith.truncf %15 : vector<16x96xf32> to vector<16x96xbf16>
      %c0_14 = arith.constant 0 : index
      %c0_15 = arith.constant 0 : index
      %17 = vector.load %arg6[%c0_14, %c0_15] : memref<16x96xbf16, #tpu.memory_space<vmem>>, vector<16x96xbf16>
      tpu.vector_store %arg6[%c0_14, %c0_15], %16 {strides = array<i32>} : memref<16x96xbf16, #tpu.memory_space<vmem>>, vector<16x96xbf16>,
    } else {
    }
    return
  }
  func.func @transform_0(%arg0: i32, %arg1: i32, %arg2: i32) -> (i32, i32) {
    %c0_i32 = arith.constant 0 : i32
    return %arg0, %arg2 : i32, i32
  }
  func.func @transform_1(%arg0: i32, %arg1: i32, %arg2: i32) -> (i32, i32) {
    %c0_i32 = arith.constant 0 : i32
    return %arg2, %arg1 : i32, i32
  }
  func.func @transform_2(%arg0: i32, %arg1: i32, %arg2: i32) -> (i32, i32) {
    %c0_i32 = arith.constant 0 : i32
    %c0_i32_0 = arith.constant 0 : i32
    return %c0_i32, %arg1 : i32, i32
  }
  func.func @transform_3(%arg0: i32, %arg1: i32, %arg2: i32) -> (i32, i32) {
    %c0_i32 = arith.constant 0 : i32
    return %arg0, %arg1 : i32, i32
  }
}

</mosaic_0001>

<bundles_post_ra>
// kernel: tpu_custom_call.1
= control target key start
LH: loop header
LB: loop body
LE: loop exit
PB: predicated region body
PF: predicated region fallthrough
CT: control target
= control target key end

     0   :  { %8 = vsyncpa [#allocation4], 0  ;;  %s350_s0 = inlined_call_operand.hbm [shape: bf16[16,32], index: 0, kind: input, shape index: {}]   ;;  %s351_s1 = inlined_call_operand.hbm [shape: bf16[32,96], index: 1, kind: input, shape index: {}]   ;;  %s352_s2 = inlined_call_operand.vmem [shape: f32[1,96], index: 2, kind: input, shape index: {}]   ;;  %s353_s3 = inlined_call_operand.hbm [shape: bf16[16,96], index: 3, kind: output, shape index: {}]  }
   0x1   :  { %9 = vsyncpa [#allocation7], 0 }
   0x2   :  { %10 = vsyncpa [#allocation5], 0  ;;  %s271_s12 = smov [#allocation3]   ;;  %s199_s16 = scalar_lea.hbm %s350_s0, 128 }
   0x3   :  { %s16_s13 = sshll.u32 %s271_s12, 4  ;;  %p200_p0 = scmp.ne.s32.totalorder %s350_s0, %s199_s16  ;;  %s17_s13 = int_to_ptr.vmem [resolvable:$true] %s16_s13 }
   0x4   :  { %p203_p1 = scmp.lt.u32.totalorder %s199_s16, %s350_s0 }
   0x6   :  { %p205_p2 = pnand %p203_p1, %p200_p0 }
   0x8   :  { %208 = shalt.err (!%p205_p2)
}
   0x9   :  { %s209_s21 = scalar_lea.vmem %s17_s13, 128  ;;  %p214_p4 = scmp.lt.s32.totalorder %s17_s13, %s17_s13 }
   0xa   :  { %p210_p3 = scmp.ne.s32.totalorder %s17_s13, %s209_s21  ;;  %p215_p5 = scmp.lt.s32.totalorder %s209_s21, %s209_s21 }
   0xc   :  { %p216_p6 = por %p215_p5, %p214_p4 }
   0xe   :  { %p217_p7 = pnand %p216_p6, %p210_p3 }
  0x10   :  { %220 = shalt.err (!%p217_p7)
}
  0x11   :  { %s272_s22 = smov 64   ;;  %s273_s23 = smov 4  }
  0x12   :  { %22 = dma.hbm_to_vmem [thread:$0]  %s350_s0, 128, %s17_s13, [#allocation4], %s272_s22, %s272_s22, %s273_s23  }
  0x13   :  { %s274_s26 = smov [#allocation6]   ;;  %s221_s30 = scalar_lea.hbm %s351_s1, 256 }
  0x14   :  { %s28_s27 = sshll.u32 %s274_s26, 4  ;;  %p222_p8 = scmp.ne.s32.totalorder %s351_s1, %s221_s30  ;;  %s29_s27 = int_to_ptr.vmem [resolvable:$true] %s28_s27 }
  0x15   :  { %p225_p9 = scmp.lt.u32.totalorder %s221_s30, %s351_s1 }
  0x17   :  { %p227_p10 = pnand %p225_p9, %p222_p8 }
  0x19   :  { %230 = shalt.err (!%p227_p10)
}
  0x1a   :  { %s231_s8 = scalar_lea.vmem %s29_s27, 256  ;;  %p236_p12 = scmp.lt.s32.totalorder %s29_s27, %s29_s27 }
  0x1b   :  { %p232_p11 = scmp.ne.s32.totalorder %s29_s27, %s231_s8  ;;  %p237_p13 = scmp.lt.s32.totalorder %s231_s8, %s231_s8 }
  0x1d   :  { %p238_p0 = por %p237_p13, %p236_p12 }
  0x1f   :  { %p239_p1 = pnand %p238_p0, %p232_p11 }
  0x21   :  { %242 = shalt.err (!%p239_p1)
}
  0x22   :  { %34 = dma.hbm_to_vmem [thread:$0]  %s351_s1, 256, %s29_s27, [#allocation7], %s272_s22, %s272_s22, %s273_s23  }
  0x23   :  { %265 = dma.done.wait [#allocation4], 128  }
  0x24   :  { %266 = vsyncadd [#allocation4], 4294967168 }
  0x25   :  { %267 = dma.done.wait [#allocation7], 256  }
  0x26   :  { %268 = vsyncadd [#allocation7], 4294967040  ;;  %vm48_vm0 = vcmask 785408   ;;  %v275_v0 = vmov 0.0   ;;  %vm276_vm1 = vmmov 0   ;;  %v196_v1 = vld [vmem:[#allocation6] sm:$0xff]  }
  0x27   :  { %49 = vst.msk [vmem:[#allocation2] sm:$0xff] %vm48_vm0, %v275_v0  ;;  %50 = vst.msk [vmem:[#allocation2 + $0x8] sm:$0xff] %vm48_vm0, %v275_v0  ;;  %181 = vmatprep.subr.bf16.mxu0 %v275_v0  ;;  %185 = vmatprep.mubr.msk.bf16.mxu0 %vm276_vm1, %v275_v0  ;;  %v197_v2 = vld [vmem:[#allocation6 + $0x8] sm:$0xff]   ;;  %v198_v3 = vld [vmem:[#allocation3] sm:$0xff]   ;;  %vm76_vm2 = vcmask 261120   ;;  %vm148_vm3 = vcmask 781312  }
  0x28   :  { %182 = vmatpush3.bf16.msra.mxu0 %v196_v1  ;;  %v173_v12 = vld [vmem:[%s352_s2] ss:$0 sm:$0xff]  ;;  %s277_s11 = smov [#allocation8]  }
  0x29   :  { %183 = vmatprep.subr.bf16.mxu0 %v275_v0  ;;  %s156_s12 = sshll.u32 %s277_s11, 4  ;;  %s157_s12 = int_to_ptr.vmem [resolvable:$true] %s156_s12 }
  0x2a   :  { %s243_s13 = scalar_lea.vmem %s157_s12, 128  ;;  %p248_p3 = scmp.lt.s32.totalorder %s157_s12, %s157_s12 }
  0x2b   :  { %p244_p2 = scmp.ne.s32.totalorder %s157_s12, %s243_s13  ;;  %p249_p4 = scmp.lt.s32.totalorder %s243_s13, %s243_s13 }
  0x2c   :  { %184 = vmatpush3.bf16.msra.mxu0 %v197_v2 }
  0x2d   :  { %p250_p5 = por %p249_p4, %p248_p3 }
  0x2e   :  { %v51_v4 = vld [vmem:[#allocation2] sm:$0xff]  ;;  %v52_v6 = vld [vmem:[#allocation2 + $0x8] sm:$0xff] }
  0x2f   :  { %186 = vmatmul.mubr.msk.bf16.vlgmr.msra.gmra.mrb[0].mxu0 %vm76_vm2, %v198_v3  ;;  %p251_p6 = pnand %p250_p5, %p244_p2 }
 0x102   :  { %v114_v5 = vpop.f32.mrb[0].mxu0 }
 0x103   :  { %v121_v7 = vadd.f32 %v114_v5, %v51_v4  ;;  %v187_v8 = vpop.f32.mrb[1].mxu0 }
 0x104   :  { %v117_v9 = vpop.f32.mrb[2].mxu0 }
 0x105   :  { %124 = vst.msk [vmem:[#allocation2] sm:$0xff] %vm48_vm0, %v121_v7  ;;  %v122_v10 = vadd.f32 %v117_v9, %v52_v6  ;;  %v188_v11 = vpop.f32.mrb[3].mxu0 }
 0x107   :  { %125 = vst.msk [vmem:[#allocation2 + $0x8] sm:$0xff] %vm48_vm0, %v122_v10 }
 0x10c   :  { %v129_v13 = vld [vmem:[#allocation2] sm:$0xff] }
 0x10d   :  { %v138_v14 = vadd.f32 %v173_v12, %v129_v13 }
 0x10e   :  { %v130_v15 = vld [vmem:[#allocation2 + $0x8] sm:$0xff] }
 0x10f   :  { %v139_v16 = vadd.f32 %v173_v12, %v130_v15  ;;  %v176_v17 = vpack.c.bf16 %v138_v14, %v138_v14 }
 0x111   :  { %v177_v18 = vpack.c.bf16 %v139_v16, %v139_v16  ;;  %149 = vst.msk [vmem:[#allocation8] sm:$0xf] %vm148_vm3, %v176_v17 }
 0x113   :  { %150 = vst.msk [vmem:[#allocation8 + $0x4] sm:$0xf] %vm148_vm3, %v177_v18 }
 0x114   :  { %254 = shalt.err (!%p251_p6)
}
 0x115   :  { %s255_s15 = scalar_lea.hbm %s353_s3, 128 }
 0x116   :  { %p256_p7 = scmp.ne.s32.totalorder %s353_s3, %s255_s15  ;;  %p259_p8 = scmp.lt.u32.totalorder %s255_s15, %s353_s3 }
 0x118   :  { %p261_p9 = pnand %p259_p8, %p256_p7 }
 0x11a   :  { %264 = shalt.err (!%p261_p9)
}
 0x11b   :  { %162 = dma.vmem_to_hbm [thread:$0]  %s157_s12, 128, %s353_s3, [#allocation5], %s272_s22, %s272_s22, %s273_s23  }
 0x11c   :  { %269 = dma.done.wait [#allocation5], 128  }
 0x11d   :  { %270 = vsyncadd [#allocation5], 4294967168 }
 0x11e   :  { %166 = vsyncpa [#allocation4], 1 }
 0x11f   :  { %167 = vsyncpa [#allocation7], 1 }
 0x120   :  { %168 = vsyncpa [#allocation5], 1 }

</bundles_post_ra>
